<compile_context>
chip_gen: v7x
topology: tpu7x:2x2x1
jax: 0.10.0
libtpu: 0.0.40
codegen_flags: <defaults>
</compile_context>

<pallas_src>
import functools

import jax
import jax.numpy as jnp
from jax import lax
from jax.experimental import pallas as pl
from jax.experimental.pallas import tpu as pltpu


_STEP_BUDGET_BYTES = 4 * 1024 * 1024   # ~4 MiB of logits per grid step
_MIN_GRID_STEPS = 8                    # keep both v7x TensorCores + pipeline busy
_VMEM_LIMIT = 32 * 1024 * 1024


def _per_pixel_focal(x, t, *, alpha, gamma, eps):
    """Per-pixel focal loss; class axis is axis=1 of x (t has size 1 there)."""
    # Numerically-stable softmax pieces over the class axis only.
    m = jnp.max(x, axis=1, keepdims=True)
    e = jnp.exp(x - m)                                   # C exps / pixel
    sum_e = jnp.sum(e, axis=1, keepdims=True)

    # Pick the target-class numerator via an iota mask (no full one-hot focal).
    cls = lax.broadcasted_iota(jnp.int32, x.shape, 1)
    e_t = jnp.sum(jnp.where(cls == t, e, 0.0), axis=1, keepdims=True)

    p_t = e_t / sum_e + eps
    one_m = 1.0 - p_t

    # (1 - p_t)^gamma: specialize small integer gamma to VPU multiplies.
    gf = float(gamma)
    if gf == int(gf) and 0 <= int(gf) <= 8:
        g = int(gf)
        if g == 0:
            w = jnp.ones_like(one_m)
        else:
            w = one_m
            for _ in range(g - 1):
                w = w * one_m
    else:
        # Clamp to avoid NaN from pow(negative, non-integer) when p_t > 1 - eps.
        w = jnp.power(jnp.maximum(one_m, 0.0), gf)

    return (-alpha) * w * jnp.log(p_t)                   # 1 log / pixel


def _focal_kernel_4d(x_ref, t_ref, out_ref, *, alpha, gamma, eps):
    # x_ref: (1, C, k, 128); t_ref/out_ref: (1, 1, k, 128)
    x = x_ref[...].astype(jnp.float32)
    t = t_ref[...]
    loss = _per_pixel_focal(x, t, alpha=alpha, gamma=gamma, eps=eps)
    out_ref[...] = loss.astype(out_ref.dtype)


def _focal_sum_kernel_4d(x_ref, t_ref, out_ref, *, alpha, gamma, eps, k, hw_rows):
    # Fused reduction: per-block partial sums (f32), tail rows masked.
    h = pl.program_id(1)
    x = x_ref[...].astype(jnp.float32)                   # (1, C, k, 128)
    t = t_ref[...]
    loss = _per_pixel_focal(x, t, alpha=alpha, gamma=gamma, eps=eps)  # (1,1,k,128)
    rows = lax.broadcasted_iota(jnp.int32, loss.shape, 2)
    valid = (h * k + rows) < hw_rows
    loss = jnp.where(valid, loss, 0.0)
    out_ref[...] = jnp.sum(loss, axis=2, keepdims=True)  # (1, 1, 1, 128)


def _focal_kernel_3d(x_ref, t_ref, out_ref, *, alpha, gamma, eps):
    # Fallback layout when HW is not a multiple of 128.
    # x_ref: (1, C, thw); t_ref/out_ref: (1, 1, thw)
    x = x_ref[...].astype(jnp.float32)
    t = t_ref[...]
    loss = _per_pixel_focal(x, t, alpha=alpha, gamma=gamma, eps=eps)
    out_ref[...] = loss.astype(out_ref.dtype)


def focal_loss(logits, target, alpha, gamma=2.0, reduction="none", eps=1e-8):
    """logits: (N, C, *) float; target: (N, *) int. Matches kornia focal_loss."""
    if reduction not in ("none", "mean", "sum"):
        raise NotImplementedError(f"Invalid reduction mode: {reduction}")

    N, C = logits.shape[0], logits.shape[1]
    spatial = logits.shape[2:]
    hw = 1
    for s in spatial:
        hw *= s
    itemsize = jnp.dtype(logits.dtype).itemsize
    kern_kwargs = dict(alpha=float(alpha), gamma=float(gamma), eps=float(eps))

    cparams = pltpu.CompilerParams(
        dimension_semantics=("parallel", "parallel"),
        vmem_limit_bytes=_VMEM_LIMIT,
    )
    cost = pl.CostEstimate(
        flops=int(6 * N * C * hw),
        transcendentals=int(N * (C + 1) * hw),     # C exps + 1 log per pixel
        bytes_accessed=int(N * hw * (itemsize * C + 4 + itemsize)),
    )

    if hw % 128 == 0:
        # --- 4-D layout: class axis is a major axis, full (8,128) vregs. ---
        hw_rows = hw // 128
        x4 = logits.reshape(N, C, hw_rows, 128)
        t4 = target.reshape(N, 1, hw_rows, 128).astype(jnp.int32)

        # Row-tile size k: ~budget bytes of logits, multiple of 8 (or full dim),
        # shrunk until the grid has >= _MIN_GRID_STEPS total steps.
        k = max(8, (_STEP_BUDGET_BYTES // (itemsize * C * 128)) // 8 * 8)
        if hw_rows < 8:
            k = hw_rows
        else:
            k = min(k, (hw_rows // 8) * 8)
            while k > 8 and N * pl.cdiv(hw_rows, k) < _MIN_GRID_STEPS:
                k = max(8, ((k // 2) // 8) * 8)

        grid = (N, pl.cdiv(hw_rows, k))
        in_specs = [
            pl.BlockSpec((1, C, k, 128), lambda n, h: (n, 0, h, 0)),
            pl.BlockSpec((1, 1, k, 128), lambda n, h: (n, 0, h, 0)),
        ]

        if reduction == "none":
            kern = functools.partial(_focal_kernel_4d, **kern_kwargs)
            out4 = pl.pallas_call(
                kern,
                out_shape=jax.ShapeDtypeStruct((N, 1, hw_rows, 128), logits.dtype),
                grid_spec=pltpu.PrefetchScalarGridSpec(
                    num_scalar_prefetch=0,
                    grid=grid,
                    in_specs=in_specs,
                    out_specs=pl.BlockSpec((1, 1, k, 128),
                                           lambda n, h: (n, 0, h, 0)),
                ),
                compiler_params=cparams,
                cost_estimate=cost,
            )(x4, t4)
            return out4.reshape((N,) + spatial)

        # Fused mean/sum: per-block partial sums (N, n_tiles, 1, 128) in f32.
        kern = functools.partial(_focal_sum_kernel_4d, **kern_kwargs,
                                 k=k, hw_rows=hw_rows)
        parts = pl.pallas_call(
            kern,
            out_shape=jax.ShapeDtypeStruct((N, grid[1], 1, 128), jnp.float32),
            grid_spec=pltpu.PrefetchScalarGridSpec(
                num_scalar_prefetch=0,
                grid=grid,
                in_specs=in_specs,
                out_specs=pl.BlockSpec((1, 1, 1, 128),
                                       lambda n, h: (n, h, 0, 0)),
            ),
            compiler_params=cparams,
            cost_estimate=cost,
        )(x4, t4)
        total = jnp.sum(parts)
        if reduction == "mean":
            total = total / (N * hw)
        return total.astype(logits.dtype)

    # --- 3-D fallback (HW not a multiple of 128): no host-side pad, the last
    # lane block is partial; garbage tail lanes are per-pixel independent and
    # masked out by Pallas on writeback / never read by the wrapper. ---
    x3 = logits.reshape(N, C, hw)
    t3 = target.reshape(N, 1, hw).astype(jnp.int32)

    if hw <= 128:
        thw = hw                                   # single full-extent block
    else:
        thw = max(128, (_STEP_BUDGET_BYTES // (itemsize * C)) // 128 * 128)
        thw = min(thw, (hw // 128) * 128)
        while thw > 128 and N * pl.cdiv(hw, thw) < _MIN_GRID_STEPS:
            thw = max(128, ((thw // 2) // 128) * 128)
    grid = (N, pl.cdiv(hw, thw))

    kern = functools.partial(_focal_kernel_3d, **kern_kwargs)
    out3 = pl.pallas_call(
        kern,
        out_shape=jax.ShapeDtypeStruct((N, 1, hw), logits.dtype),
        grid_spec=pltpu.PrefetchScalarGridSpec(
            num_scalar_prefetch=0,
            grid=grid,
            in_specs=[
                pl.BlockSpec((1, C, thw), lambda n, h: (n, 0, h)),
                pl.BlockSpec((1, 1, thw), lambda n, h: (n, 0, h)),
            ],
            out_specs=pl.BlockSpec((1, 1, thw), lambda n, h: (n, 0, h)),
        ),
        compiler_params=cparams,
        cost_estimate=cost,
    )(x3, t3)
    loss_tmp = out3[:, 0, :].reshape((N,) + spatial)

    # TODO(synk): fused in-kernel reduction is only implemented on the
    # 128-aligned (4-D) path; the rare non-aligned fallback reduces in XLA.
    if reduction == "none":
        return loss_tmp
    total = jnp.sum(loss_tmp.astype(jnp.float32))
    if reduction == "mean":
        total = total / (N * hw)
    return total.astype(logits.dtype)


class FocalLoss:
    """JAX/Pallas port of kornia.losses.FocalLoss (no learned parameters)."""

    def __init__(self, alpha, gamma=2.0, reduction="none", eps=1e-8):
        self.alpha = alpha
        self.gamma = gamma
        self.reduction = reduction
        self.eps = eps

    def __call__(self, input, target):
        return focal_loss(input, target, self.alpha, self.gamma,
                          self.reduction, self.eps)


def _reference_focal(logits, target, alpha, gamma, reduction, eps):
    p = jax.nn.softmax(logits, axis=1) + eps
    onehot = jax.nn.one_hot(target, logits.shape[1], axis=1, dtype=logits.dtype)
    focal = -alpha * jnp.power(1.0 - p, gamma) * jnp.log(p)
    loss_tmp = jnp.sum(onehot * focal, axis=1)
    if reduction == "none":
        return loss_tmp
    if reduction == "mean":
        return jnp.mean(loss_tmp)
    return jnp.sum(loss_tmp)


if __name__ == "__main__":
    key = jax.random.PRNGKey(0)
    k1, k2 = jax.random.split(key)

    N, C, H, W = 2, 4, 16, 16
    logits = jax.random.normal(k1, (N, C, H, W), dtype=jnp.float32)
    target = jax.random.randint(k2, (N, H, W), 0, C, dtype=jnp.int32)

    # reduction='none' (per-pixel loss) on the 4-D layout path
    criterion = FocalLoss(alpha=0.5, gamma=2.0, reduction="none")
    out = jax.block_until_ready(criterion(logits, target))
    ref = _reference_focal(logits, target, 0.5, 2.0, "none", 1e-8)
    assert out.shape == (N, H, W)
    assert jnp.allclose(out, ref, atol=1e-5, rtol=1e-5)

    # fused in-kernel reduction ('mean')
    criterion_m = FocalLoss(alpha=0.5, gamma=2.0, reduction="mean")
    out_m = jax.block_until_ready(criterion_m(logits, target))
    ref_m = _reference_focal(logits, target, 0.5, 2.0, "mean", 1e-8)
    assert jnp.allclose(out_m, ref_m, atol=1e-6, rtol=1e-6)

    # non-integer gamma + fused 'sum'
    criterion_g = FocalLoss(alpha=0.25, gamma=1.5, reduction="sum")
    out_g = jax.block_until_ready(criterion_g(logits, target))
    ref_g = _reference_focal(logits, target, 0.25, 1.5, "sum", 1e-8)
    assert jnp.allclose(out_g, ref_g, atol=1e-4, rtol=1e-5)

    # Non-128-aligned spatial size exercises the 3-D fallback (no host-side pad)
    H2, W2 = 7, 9
    logits2 = jax.random.normal(k1, (N, C, H2, W2), dtype=jnp.float32)
    target2 = jax.random.randint(k2, (N, H2, W2), 0, C, dtype=jnp.int32)
    out2 = jax.block_until_ready(FocalLoss(0.5, 2.0, "none")(logits2, target2))
    ref2 = _reference_focal(logits2, target2, 0.5, 2.0, "none", 1e-8)
    assert out2.shape == (N, H2, W2)
    assert jnp.allclose(out2, ref2, atol=1e-5, rtol=1e-5)

    print("KERNEL_OK")
</pallas_src>

<mosaic_0001>
module attributes {stable_mosaic.version = 11 : i64} {
  func.func @_focal_kernel_4d(%arg0: i32, %arg1: i32, %arg2: memref<1x4x2x128xf32, #tpu.memory_space<vmem>>, %arg3: memref<1x1x2x128xi32, #tpu.memory_space<vmem>>, %arg4: memref<1x1x2x128xf32, #tpu.memory_space<vmem>>) attributes {dimension_semantics = [#tpu.dimension_semantics<parallel>, #tpu.dimension_semantics<parallel>], iteration_bounds = array<i64: 2, 1>, scalar_prefetch = 0 : i64, scratch_operands = 0 : i64, tpu.core_type = #tpu.core_type<tc>, window_params = [{transform_indices = @transform_0, window_bounds = array<i64: 1, 4, 2, 128>}, {transform_indices = @transform_1, window_bounds = array<i64: 1, 1, 2, 128>}, {transform_indices = @transform_2, window_bounds = array<i64: 1, 1, 2, 128>}]} {
    %c0 = arith.constant 0 : index
    %c0_0 = arith.constant 0 : index
    %c0_1 = arith.constant 0 : index
    %c0_2 = arith.constant 0 : index
    %0 = vector.load %arg2[%c0, %c0_0, %c0_1, %c0_2] : memref<1x4x2x128xf32, #tpu.memory_space<vmem>>, vector<1x4x2x128xf32>
    %c0_3 = arith.constant 0 : index
    %c0_4 = arith.constant 0 : index
    %c0_5 = arith.constant 0 : index
    %c0_6 = arith.constant 0 : index
    %1 = vector.load %arg3[%c0_3, %c0_4, %c0_5, %c0_6] : memref<1x1x2x128xi32, #tpu.memory_space<vmem>>, vector<1x1x2x128xi32>
    %cst = arith.constant dense<0xFF800000> : vector<1x2x128xf32>
    %2 = vector.multi_reduction <maximumf>, %0, %cst [1] : vector<1x4x2x128xf32> to vector<1x2x128xf32>
    %3 = vector.shape_cast %2 : vector<1x2x128xf32> to vector<1x1x2x128xf32>
    %4 = vector.broadcast %3 : vector<1x1x2x128xf32> to vector<1x4x2x128xf32>
    %5 = arith.subf %0, %4 : vector<1x4x2x128xf32>
    %6 = math.exp %5 : vector<1x4x2x128xf32>
    %cst_7 = arith.constant dense<0.000000e+00> : vector<1x2x128xf32>
    %7 = vector.multi_reduction <add>, %6, %cst_7 [1] : vector<1x4x2x128xf32> to vector<1x2x128xf32>
    %8 = vector.shape_cast %7 : vector<1x2x128xf32> to vector<1x1x2x128xf32>
    %9 = tpu.iota {dimensions = array<i32: 1>} : vector<1x4x2x128xi32>
    %10 = vector.broadcast %1 : vector<1x1x2x128xi32> to vector<1x4x2x128xi32>
    %11 = arith.cmpi eq, %9, %10 : vector<1x4x2x128xi32>
    %cst_8 = arith.constant 0.000000e+00 : f32
    %12 = vector.broadcast %cst_8 : f32 to vector<1x4x2x128xf32>
    %13 = arith.select %11, %6, %12 : vector<1x4x2x128xi1>, vector<1x4x2x128xf32>
    %cst_9 = arith.constant dense<0.000000e+00> : vector<1x2x128xf32>
    %14 = vector.multi_reduction <add>, %13, %cst_9 [1] : vector<1x4x2x128xf32> to vector<1x2x128xf32>
    %15 = vector.shape_cast %14 : vector<1x2x128xf32> to vector<1x1x2x128xf32>
    %16 = arith.divf %15, %8 : vector<1x1x2x128xf32>
    %cst_10 = arith.constant 9.99999993E-9 : f32
    %17 = vector.broadcast %cst_10 : f32 to vector<1x1x2x128xf32>
    %18 = arith.addf %16, %17 : vector<1x1x2x128xf32>
    %cst_11 = arith.constant 1.000000e+00 : f32
    %19 = vector.broadcast %cst_11 : f32 to vector<1x1x2x128xf32>
    %20 = arith.subf %19, %18 : vector<1x1x2x128xf32>
    %21 = arith.mulf %20, %20 : vector<1x1x2x128xf32>
    %cst_12 = arith.constant -5.000000e-01 : f32
    %22 = vector.broadcast %cst_12 : f32 to vector<1x1x2x128xf32>
    %23 = arith.mulf %22, %21 : vector<1x1x2x128xf32>
    %24 = math.log %18 : vector<1x1x2x128xf32>
    %25 = arith.mulf %23, %24 : vector<1x1x2x128xf32>
    %c0_13 = arith.constant 0 : index
    %c0_14 = arith.constant 0 : index
    %c0_15 = arith.constant 0 : index
    %c0_16 = arith.constant 0 : index
    %26 = vector.load %arg4[%c0_13, %c0_14, %c0_15, %c0_16] : memref<1x1x2x128xf32, #tpu.memory_space<vmem>>, vector<1x1x2x128xf32>
    tpu.vector_store %arg4[%c0_13, %c0_14, %c0_15, %c0_16], %25 {strides = array<i32>} : memref<1x1x2x128xf32, #tpu.memory_space<vmem>>, vector<1x1x2x128xf32>,
    return
  }
  func.func @transform_0(%arg0: i32, %arg1: i32) -> (i32, i32, i32, i32) {
    %c0_i32 = arith.constant 0 : i32
    %c0_i32_0 = arith.constant 0 : i32
    %c0_i32_1 = arith.constant 0 : i32
    return %arg0, %c0_i32, %arg1, %c0_i32_0 : i32, i32, i32, i32
  }
  func.func @transform_1(%arg0: i32, %arg1: i32) -> (i32, i32, i32, i32) {
    %c0_i32 = arith.constant 0 : i32
    %c0_i32_0 = arith.constant 0 : i32
    %c0_i32_1 = arith.constant 0 : i32
    return %arg0, %c0_i32, %arg1, %c0_i32_0 : i32, i32, i32, i32
  }
  func.func @transform_2(%arg0: i32, %arg1: i32) -> (i32, i32, i32, i32) {
    %c0_i32 = arith.constant 0 : i32
    %c0_i32_0 = arith.constant 0 : i32
    %c0_i32_1 = arith.constant 0 : i32
    return %arg0, %c0_i32, %arg1, %c0_i32_0 : i32, i32, i32, i32
  }
}

</mosaic_0001>

<bundles_post_ra>
// kernel: tpu_custom_call.1
= control target key start
LH: loop header
LB: loop body
LE: loop exit
PB: predicated region body
PF: predicated region fallthrough
CT: control target
= control target key end

     0   :  { %7 = vsyncpa [#allocation3], 0  ;;  %s894_s0 = inlined_call_operand.hbm [shape: f32[2,4,2,128], index: 0, kind: input, shape index: {}]   ;;  %s895_s1 = inlined_call_operand.hbm [shape: s32[2,1,2,128], index: 1, kind: input, shape index: {}]   ;;  %s896_s2 = inlined_call_operand.hbm [shape: f32[2,1,2,128], index: 2, kind: output, shape index: {}]  }
   0x1   :  { %9 = vsyncpa [#allocation3 + $0x1], 0 }
   0x2   :  { %10 = vsyncpa [#allocation6], 0 }
   0x3   :  { %12 = vsyncpa [#allocation6 + $0x1], 0 }
   0x4   :  { %13 = vsyncpa [#allocation4], 0 }
   0x5   :  { %15 = vsyncpa [#allocation4 + $0x1], 0  ;;  %s663_s9 = smov 0   ;;  %s665_s10 = smov 0  }
   0x6   :  { %s667_s11 = smov 0   ;;  %s669_s12 = smov 0  }
   0x7   :  { %s671_s13 = smov 0   ;;  %s673_s14 = smov 0  }
   0x8 LB: > { %s396_s15 = sadd.s32 4294967295, %s641_s14   ;;  %s397_s16 = sadd.s32 4294967294, %s641_s14   ;;  %s641_s14 = sphi %s673_s14, %s21_s14   ;;  %s637_s13 = sphi %s671_s13, %s915_s13   ;;  %s633_s12 = sphi %s669_s12, %s914_s12   ;;  %s629_s11 = sphi %s667_s11, %s913_s11   ;;  %s625_s10 = sphi %s665_s10, %s912_s10   ;;  %s621_s9 = sphi %s663_s9, %s911_s9  }
   0x9   : > { %s33_s17 = sadd.s32 1, %s637_s13  ;;  %s42_s18 = sadd.s32 1, %s629_s11 }
   0xa   : > { %p35_p0 = scmp.ge.s32.totalorder %s33_s17, 2  ;;  %p49_p1 = scmp.ne.s32.totalorder %s629_s11, %s625_s10 }
   0xb   : > { %p50_p2 = scmp.eq.s32.totalorder %s641_s14, 0  ;;  %p55_p3 = scmp.ne.s32.totalorder %s625_s10, %s621_s9 }
   0xc   : > { %s917_s17 = smov (%p35_p0, %s33_s17), 0  ;;  %p56_p5 = scmp.eq.s32.totalorder %s396_s15, 0 }
   0xd   : > { %p704_p4 = por %p50_p2, %p49_p1  ;;  %s37_s20 = ssub.s32 %s637_s13, %s917_s17 }
   0xe   : > { %p109_p6 = scmp.eq.s32.totalorder %s396_s15, 1  ;;  %p40_p7 = scmp.eq.s32.totalorder %s37_s20, 0 }
   0xf   : > { %p710_p8 = por %p56_p5, %p55_p3  ;;  %p115_p10 = scmp.eq.s32.totalorder %s397_s16, 1 }
  0x10   : > { %p714_p9 = por %p109_p6, %p49_p1  ;;  %p431_p13 = scmp.lt.s32.totalorder %s641_s14, 2 }
  0x11   : > { %s900_s21 = scalar_select %p710_p8, 1, 0 }
  0x12   : > { %s901_s22 = scalar_select %p714_p9, 1, 0 }
  0x13   : > { %s719_s23 = scalar_select %p40_p7, %s629_s11, %s42_s18  }
  0x14   : > { %p721_p11 = por %p115_p10, %p55_p3  ;;  %s728_s25 = sand.u32 1, %s629_s11  }
  0x15   : > { %s400_s26 = sshll.u32 %s728_s25, 3  ;;  %s413_s27 = sshll.u32 %s637_s13, 7 }
  0x16   : > { %s902_s24 = scalar_select %p721_p11, 1, 0 }
  0x17   : > { %s735_s30 = scalar_lea.hbm %s894_s0, %s413_s27  ;;  %s139_s3 = scalar_lea.vmem [#allocation2], %s400_s26 }
  0x18   : > { %s147_s4 = sshll.u32 %s139_s3, 4  ;;  %p741_p0 = pnand %p431_p13, %p704_p4  ;;  %s737_s4 = int_to_ptr.vmem [resolvable:$true] %s147_s4 }
  0x19   : > { %s136_s6 = scalar_lea.sflag [#allocation3], %s728_s25  ;;  %s495_s7 = scalar_lea.hbm %s735_s30, 128 }
  0x1a   : > { %p496_p2 = scmp.ne.s32.totalorder %s735_s30, %s495_s7  ;;  %p497_p3 = pneg %p741_p0 }
  0x1b   : > { %s500_s16 = scalar_lea.hbm %s894_s0, 256  ;;  %p501_p4 = scmp.lt.u32.totalorder %s735_s30, %s894_s0 }
  0x1c   : > { %p498_p5 = pnand %p497_p3, %p496_p2  ;;  %p502_p7 = scmp.lt.u32.totalorder %s500_s16, %s495_s7 }
  0x1d   : > { %p504_p13 = scmp.lt.u32.totalorder %s495_s7, %s735_s30 }
  0x1e   : > { %p499_p6 = pneg %p498_p5  ;;  %p503_p10 = por %p502_p7, %p501_p4 }
  0x20   : > { %p505_p12 = por %p504_p13, %p503_p10 }
  0x22   : > { %p506_p1 = pnand %p505_p12, %p499_p6 }
  0x24   : > { %509 = shalt.err (!%p506_p1)
}
  0x25   : > { %s510_s20 = scalar_lea.vmem %s737_s4, 128  ;;  %s643_s26 = smov [#allocation2]  }
  0x26   : > { %p511_p2 = scmp.ne.s32.totalorder %s737_s4, %s510_s20  ;;  %s515_s27 = sshll.u32 %s643_s26, 4  ;;  %s516_s27 = int_to_ptr.vmem [resolvable:$false] %s515_s27 }
  0x27   : > { %s517_s28 = scalar_lea.vmem %s516_s27, 256  ;;  %p518_p9 = scmp.lt.s32.totalorder %s737_s4, %s516_s27 }
  0x28   : > { %p513_p5 = pnand %p511_p2, %p497_p3  ;;  %p519_p4 = scmp.lt.s32.totalorder %s517_s28, %s510_s20 }
  0x2a   : > { %p514_p11 = pneg %p513_p5  ;;  %p520_p7 = por %p519_p4, %p518_p9 }
  0x2c   : > { %p521_p10 = pnand %p520_p7, %p514_p11 }
  0x2e   : > { %524 = shalt.err (!%p521_p10)
}
  0x2f   : > { %s644_s29 = smov 32   ;;  %s645_s3 = smov 2  }
  0x30   : > { %423 = dma.hbm_to_vmem [thread:$0]  (!%p741_p0), %s735_s30, 128, %s737_s4, %s136_s6, %s644_s29, %s644_s29, %s645_s3  }
  0x31   : > { %p174_p12 = scmp.lt.s32.totalorder %s641_s14, 3  ;;  %s403_s7 = sshll.u32 %s728_s25, 1 }
  0x32   : > { %s404_s8 = sshll.u32 %s637_s13, 5  ;;  %p904_p9 = scmp.ge.s32.totalorder %s641_s14, 1 }
  0x33   : > { %s786_s19 = scalar_lea.hbm %s895_s1, %s404_s8  ;;  %s161_s20 = scalar_lea.vmem [#allocation5], %s403_s7 }
  0x34   : > { %p779_p11 = pnand %p904_p9, %p174_p12  ;;  %s169_s26 = sshll.u32 %s161_s20, 4  ;;  %s170_s26 = int_to_ptr.vmem [resolvable:$true] %s169_s26 }
  0x35   : > { %s158_s30 = scalar_lea.sflag [#allocation6], %s728_s25  ;;  %s525_s4 = scalar_lea.hbm %s786_s19, 32 }
  0x36   : > { %s905_s15 = scalar_select %p779_p11, 1, 0 }
  0x37   : > { %p526_p1 = scmp.ne.s32.totalorder %s786_s19, %s525_s4  ;;  %s530_s28 = scalar_lea.hbm %s895_s1, 64 }
  0x38   : > { %p531_p2 = scmp.lt.u32.totalorder %s786_s19, %s895_s1  ;;  %p532_p5 = scmp.lt.u32.totalorder %s530_s28, %s525_s4 }
  0x39   : > { %p528_p6 = pnand %p526_p1, %p497_p3  ;;  %p534_p7 = scmp.lt.u32.totalorder %s525_s4, %s786_s19 }
  0x3a   : > { %p533_p4 = por %p532_p5, %p531_p2 }
  0x3b   : > { %p529_p13 = pneg %p528_p6 }
  0x3c   : > { %p535_p10 = por %p534_p7, %p533_p4 }
  0x3e   : > { %p536_p12 = pnand %p535_p10, %p529_p13 }
  0x40   : > { %539 = shalt.err (!%p536_p12)
}
  0x41   : > { %s540_s25 = scalar_lea.vmem %s170_s26, 32  ;;  %s646_s7 = smov [#allocation5]  }
  0x42   : > { %p541_p9 = scmp.ne.s32.totalorder %s170_s26, %s540_s25  ;;  %s545_s8 = sshll.u32 %s646_s7, 4  ;;  %s546_s8 = int_to_ptr.vmem [resolvable:$false] %s545_s8 }
  0x43   : > { %s547_s16 = scalar_lea.vmem %s546_s8, 64  ;;  %p548_p8 = scmp.lt.s32.totalorder %s170_s26, %s546_s8 }
  0x44   : > { %p543_p1 = pnand %p541_p9, %p497_p3  ;;  %p549_p11 = scmp.lt.s32.totalorder %s547_s16, %s540_s25 }
  0x46   : > { %p544_p6 = pneg %p543_p1  ;;  %p550_p2 = por %p549_p11, %p548_p8 }
  0x48   : > { %p551_p5 = pnand %p550_p2, %p544_p6 }
  0x4a   : > { %554 = shalt.err (!%p551_p5)
}
  0x4b   : > { %426 = dma.hbm_to_vmem [thread:$0]  (!%p741_p0), %s786_s19, 32, %s170_s26, %s158_s30  }
  0x4c   : > { %p906_p13 = scmp.ne.s32.totalorder %s905_s15, 0 }
  0x4d   : > { %s811_s18 = sand.u32 (!%p906_p13), 1, %s625_s10   ;;  %p907_p3 = scmp.ne.s32.totalorder (!%p906_p13), %s900_s21, 0 }
  0x4e   : > { %178 = sbr.rel (%p906_p13) target bundleno = 163 (0xa3), region = 28  ;;  %s406_s20 = sshll.u32 (!%p906_p13), %s811_s18, 3 }
  0x4f   : > { %s181_s4 = scalar_lea.sflag (!%p906_p13), [#allocation3], %s811_s18  ;;  %s184_s6 = scalar_lea.vmem (!%p906_p13), [#allocation2], %s406_s20 }
  0x55   : > { %608 = dma.done.wait (%p907_p3), %s181_s4, 128  }
  0x56   : > { %610 = vsyncadd (%p907_p3), %s181_s4, 4294967168  ;;  %s407_s5 = sshll.u32 %s811_s18, 1  ;;  %s190_s15 = scalar_lea.sflag [#allocation6], %s811_s18 }
  0x57   : > { %s193_s19 = scalar_lea.vmem [#allocation5], %s407_s5 }
  0x58   : > { %612 = dma.done.wait (%p907_p3), %s190_s15, 32  }
  0x59   : > { %614 = vsyncadd (%p907_p3), %s190_s15, 4294967264  ;;  %vm224_vm0 = vcmask 1041408   ;;  %v219_v0 = vld [vmem:[%s184_s6] sm:$0x3]  ;;  %v220_v1 = vld [vmem:[%s184_s6 + $0x2] sm:$0x3] }
  0x5a   : > { %v221_v2 = vld [vmem:[%s184_s6 + $0x4] sm:$0x3]  ;;  %v222_v3 = vld [vmem:[%s184_s6 + $0x6] sm:$0x3]  ;;  %v225_v4 = vsel %vm224_vm0, %v219_v0, -inf  ;;  %v226_v5 = vsel %vm224_vm0, %v220_v1, -inf }
  0x5b   : > { %v227_v6 = vsel %vm224_vm0, %v221_v2, -inf  ;;  %v228_v7 = vsel %vm224_vm0, %v222_v3, -inf  ;;  %v229_v8 = vmax.f32 %v225_v4, %v226_v5  ;;  %v223_v19 = vld [vmem:[%s193_s19] sm:$0x3]  ;;  %s218_s21 = scalar_lea.vmem [#allocation7], %s407_s5  ;;  %s410_s30 = sshll.u32 %s633_s12, 5 }
  0x5c   : > { %v230_v9 = vmax.f32 %v227_v6, %v228_v7  ;;  %vm251_vm1 = vcmp.eq.s32.totalorder %v223_v19, 0  ;;  %vm252_vm2 = vcmp.eq.s32.totalorder %v223_v19, 1  ;;  %vm253_vm3 = vcmp.eq.s32.totalorder %v223_v19, 2  ;;  %s291_s26 = sshll.u32 %s218_s21, 4  ;;  %s847_s29 = scalar_lea.hbm %s896_s2, %s410_s30  ;;  %s842_s26 = int_to_ptr.vmem [resolvable:$true] %s291_s26 }
  0x5d   : > { %vm254_vm4 = vcmp.eq.s32.totalorder %v223_v19, 3  ;;  %s277_s3 = scalar_lea.sflag [#allocation4], %s811_s18  ;;  %s555_s25 = scalar_lea.vmem %s842_s26, 32 }
  0x5e   : > { %v231_v10 = vmax.f32 %v229_v8, %v230_v9  ;;  %p556_p8 = scmp.ne.s32.totalorder %s842_s26, %s555_s25  ;;  %p908_p0 = scmp.ne.s32.totalorder %s901_s22, 0 }
  0x5f   : > { %s647_s12 = smov [#allocation7]  }
  0x60   : > { %v232_v11 = vsub.f32 %v219_v0, %v231_v10  ;;  %v233_v12 = vsub.f32 %v220_v1, %v231_v10  ;;  %v234_v13 = vsub.f32 %v221_v2, %v231_v10  ;;  %v235_v14 = vsub.f32 %v222_v3, %v231_v10  ;;  %p557_p11 = pnand %p556_p8, %p908_p0  ;;  %s559_s7 = sshll.u32 %s647_s12, 4  ;;  %s560_s7 = int_to_ptr.vmem [resolvable:$false] %s559_s7 }
  0x61   : > { %s561_s8 = scalar_lea.vmem %s560_s7, 64  ;;  %p562_p7 = scmp.lt.s32.totalorder %s842_s26, %s560_s7 }
  0x62   : > { %v236_v15 = vmul.f32 1.442695, %v232_v11  ;;  %v238_v16 = vmul.f32 1.442695, %v233_v12  ;;  %v240_v17 = vmul.f32 1.442695, %v234_v13  ;;  %p558_p4 = pneg %p557_p11  ;;  %p563_p10 = scmp.lt.s32.totalorder %s561_s8, %s555_s25 }
  0x63   : > { %v242_v18 = vmul.f32 1.442695, %v235_v14 }
  0x64   : > { %483 = vpow2.f32 %v236_v15  ;;  %p564_p12 = por %p563_p10, %p562_p7 }
  0x65   : > { %485 = vpow2.f32 %v238_v16 }
  0x66   : > { %487 = vpow2.f32 %v240_v17  ;;  %p565_p9 = pnand %p564_p12, %p558_p4 }
  0x67   : > { %489 = vpow2.f32 %v242_v18 }
  0x6e   : > { %v484_v20 = vpop.eup %483 }
  0x6f   : > { %v486_v21 = vpop.eup %485  ;;  %v244_v22 = vsel %vm224_vm0, %v484_v20, 0.0  ;;  %v255_v25 = vsel %vm251_vm1, %v484_v20, 0.0 }
  0x70   : > { %v488_v23 = vpop.eup %487  ;;  %v245_v24 = vsel %vm224_vm0, %v486_v21, 0.0  ;;  %v256_v26 = vsel %vm252_vm2, %v486_v21, 0.0  ;;  %v259_v32 = vsel %vm224_vm0, %v255_v25, 0.0 }
  0x71   : > { %v490_v27 = vpop.eup %489  ;;  %v246_v28 = vadd.f32 %v245_v24, %v244_v22  ;;  %v247_v29 = vsel %vm224_vm0, %v488_v23, 0.0  ;;  %v260_v33 = vsel %vm224_vm0, %v256_v26, 0.0  ;;  %v257_v34 = vsel %vm253_vm3, %v488_v23, 0.0 }
  0x72   : > { %v249_v30 = vsel %vm224_vm0, %v490_v27, 0.0  ;;  %v261_v36 = vadd.f32 %v260_v33, %v259_v32  ;;  %v262_v37 = vsel %vm224_vm0, %v257_v34, 0.0  ;;  %v258_v38 = vsel %vm254_vm4, %v490_v27, 0.0 }
  0x73   : > { %v248_v31 = vadd.f32 %v247_v29, %v246_v28  ;;  %v264_v40 = vsel %vm224_vm0, %v258_v38, 0.0 }
  0x74   : > { %v263_v39 = vadd.f32 %v262_v37, %v261_v36 }
  0x75   : > { %v250_v35 = vadd.f32 %v249_v30, %v248_v31 }
  0x76   : > { %v265_v41 = vadd.f32 %v264_v40, %v263_v39 }
  0x77   : > { %491 = vrcp.f32 %v250_v35 }
  0x81   : > { %v492_v42 = vpop.eup %491 }
  0x82   : > { %v267_v43 = vmul.f32 %v492_v42, %v265_v41 }
  0x84   : > { %v268_v44 = vadd.f32 1e-08, %v267_v43 }
  0x86   : > { %493 = vlog2.f32 %v268_v44  ;;  %v269_v45 = vsub.f32 1.0, %v268_v44 }
  0x88   : > { %v270_v46 = vmul.f32 %v269_v45, %v269_v45 }
  0x8a   : > { %v271_v47 = vmul.f32 -0.5, %v270_v46 }
  0x90   : > { %v494_v48 = vpop.eup %493 }
  0x91   : > { %v273_v49 = vmul.f32 0.6931472, %v494_v48 }
  0x93   : > { %v274_v50 = vmul.f32 %v273_v49, %v271_v47 }
  0x95   : > { %275 = vst [vmem:[%s218_s21] sm:$0x3] %v274_v50 }
  0x96   : > { %568 = shalt.err (!%p565_p9)
}
  0x97   : > { %s569_s16 = scalar_lea.hbm %s847_s29, 32  ;;  %s573_s4 = scalar_lea.hbm %s896_s2, 64 }
  0x98   : > { %p570_p1 = scmp.ne.s32.totalorder %s847_s29, %s569_s16  ;;  %p574_p5 = scmp.lt.u32.totalorder %s847_s29, %s896_s2 }
  0x99   : > { %p575_p13 = scmp.lt.u32.totalorder %s573_s4, %s569_s16  ;;  %p577_p8 = scmp.lt.u32.totalorder %s569_s16, %s847_s29 }
  0x9a   : > { %p571_p6 = pnand %p570_p1, %p908_p0 }
  0x9b   : > { %p576_p3 = por %p575_p13, %p574_p5 }
  0x9c   : > { %p572_p2 = pneg %p571_p6 }
  0x9d   : > { %p578_p11 = por %p577_p8, %p576_p3 }
  0x9f   : > { %p579_p4 = pnand %p578_p11, %p572_p2 }
  0xa1   : > { %582 = shalt.err (!%p579_p4)
}
  0xa2   : > { %418 = dma.vmem_to_hbm [thread:$0]  (%p908_p0), %s842_s26, 32, %s847_s29, %s277_s3  }
  0xa3 PF: > { %s303_s15 = sand.u32 1, %s621_s9   ;;  %p909_p7 = scmp.ne.s32.totalorder %s902_s24, 0 }
  0xa4   : > { %p910_p10 = scmp.ge.s32.totalorder %s641_s14, 2  ;;  %s304_s19 = scalar_lea.sflag [#allocation4], %s303_s15 }
  0xa6   : > { %p428_p12 = pnand %p910_p10, %p909_p7 }
  0xa8   : > { %616 = dma.done.wait (!%p428_p12), %s304_s19, 32  }
  0xa9   : > { %618 = vsyncadd (!%p428_p12), %s304_s19, 4294967264  ;;  %s21_s14 = sadd.s32 1, %s641_s14   ;;  %s911_s9 = smov %s625_s10 }
  0xaa   : > { %p18_p9 = scmp.ge.s32.totalorder %s21_s14, 4   ;;  %s912_s10 = smov %s629_s11 }
  0xab   : > { %s913_s11 = smov %s719_s23  ;;  %s914_s12 = smov %s637_s13 }
  0xac   : > { %s915_s13 = smov %s917_s17  ;;  %20 = sbr.rel (!%p18_p9) target bundleno = 8 (0x8), region = 86 }
  0xb3   :  { %309 = vsyncpa [#allocation3], 1 }
  0xb4   :  { %311 = vsyncpa [#allocation3 + $0x1], 1 }
  0xb5   :  { %312 = vsyncpa [#allocation6], 1 }
  0xb6   :  { %314 = vsyncpa [#allocation6 + $0x1], 1 }
  0xb7   :  { %315 = vsyncpa [#allocation4], 1 }
  0xb8   :  { %317 = vsyncpa [#allocation4 + $0x1], 1 }

</bundles_post_ra>
